<compile_context>
chip_gen: v5e
topology: v5e:2x2
jax: 0.10.0
libtpu: 0.0.40
codegen_flags: <defaults>
</compile_context>

<pallas_src>
import jax
import jax.numpy as jnp
from jax.experimental import pallas as pl
from jax.experimental.pallas import tpu as pltpu


PAD = 128  # lane-dense width for hidden (2*H) and output (out+tril) packing


def fused_policy_kernel(x_ref, w1_ref, w2_ref, w3_ref, b_ref, o_ref):
    """Both MLP heads fused: 3 matmuls total, lane-dense (B, 128) output."""
    x = x_ref[...]
    b1 = b_ref[0:1, :]   # (1, 128) broadcast over batch sublanes
    b2 = b_ref[1:2, :]
    b3 = b_ref[2:3, :]
    h1 = jnp.dot(x, w1_ref[...], preferred_element_type=jnp.float32) + b1
    h1 = jnp.maximum(h1, 0.0)
    h2 = jnp.dot(h1, w2_ref[...], preferred_element_type=jnp.float32) + b2
    h2 = jnp.maximum(h2, 0.0)
    o = jnp.dot(h2, w3_ref[...], preferred_element_type=jnp.float32) + b3
    o_ref[...] = o.astype(o_ref.dtype)


def init_linear(key, fan_in, fan_out, dtype=jnp.float32):
    """PyTorch nn.Linear default init: U[-1/sqrt(fan_in), 1/sqrt(fan_in)].

    Stored as (in, out) so the math is x @ W + b (== PyTorch x @ W.T + b).
    """
    kw, kb = jax.random.split(key)
    bound = 1.0 / jnp.sqrt(jnp.asarray(fan_in, dtype))
    w = jax.random.uniform(kw, (fan_in, fan_out), dtype, -bound, bound)
    b = jax.random.uniform(kb, (1, fan_out), dtype, -bound, bound)
    return w, b


def init_head(key, input_dim, hidden_dim, out_dim):
    k1, k2, k3 = jax.random.split(key, 3)
    w1, b1 = init_linear(k1, input_dim, hidden_dim)
    w2, b2 = init_linear(k2, hidden_dim, hidden_dim)
    w3, b3 = init_linear(k3, hidden_dim, out_dim)
    return (w1, b1, w2, b2, w3, b3)


def pack_policy_params(mu_params, cov_params, input_dim, hidden_dim,
                       output_dim, tril_dim):
    """Pack both heads into zero-padded block matrices (done once, not per step).

    Layer 1: W1 (in, 128)   = [W1_mu | W1_cov | 0]
    Layer 2: W2 (128, 128)  = blockdiag(W2_mu, W2_cov, 0)
    Layer 3: W3 (128, 128)  : rows 0..H-1 -> cols [0, out) = W3_mu,
                              rows H..2H-1 -> cols [out, out+tril) = W3_cov.
    Biases stacked into one (3, 128) array.
    """
    assert 2 * hidden_dim <= PAD and output_dim + tril_dim <= PAD
    w1m, b1m, w2m, b2m, w3m, b3m = mu_params
    w1c, b1c, w2c, b2c, w3c, b3c = cov_params
    H = hidden_dim
    f32 = jnp.float32

    W1 = jnp.zeros((input_dim, PAD), f32)
    W1 = W1.at[:, :H].set(w1m).at[:, H:2 * H].set(w1c)

    W2 = jnp.zeros((PAD, PAD), f32)
    W2 = W2.at[:H, :H].set(w2m).at[H:2 * H, H:2 * H].set(w2c)

    W3 = jnp.zeros((PAD, PAD), f32)
    W3 = W3.at[:H, :output_dim].set(w3m)
    W3 = W3.at[H:2 * H, output_dim:output_dim + tril_dim].set(w3c)

    B1 = jnp.zeros((1, PAD), f32).at[:, :H].set(b1m).at[:, H:2 * H].set(b1c)
    B2 = jnp.zeros((1, PAD), f32).at[:, :H].set(b2m).at[:, H:2 * H].set(b2c)
    B3 = jnp.zeros((1, PAD), f32)
    B3 = B3.at[:, :output_dim].set(b3m)
    B3 = B3.at[:, output_dim:output_dim + tril_dim].set(b3c)
    Bstack = jnp.concatenate([B1, B2, B3], axis=0)  # (3, 128)

    return (W1, W2, W3, Bstack)


def mv_gaussian_policy_forward(x, packed_params, output_dim, tril_dim):
    """Pallas equivalent of MVGaussianPolicy.forward: returns (mu, cov)."""
    W1, W2, W3, Bstack = packed_params
    batch = x.shape[0]
    vmem_spec = pl.BlockSpec(memory_space=pltpu.MemorySpace.VMEM)
    out = pl.pallas_call(
        fused_policy_kernel,
        out_shape=jax.ShapeDtypeStruct((batch, PAD), x.dtype),
        in_specs=[vmem_spec] * 5,
        out_specs=vmem_spec,
    )(x, W1, W2, W3, Bstack)
    mu = out[:, :output_dim]
    cov = out[:, output_dim:output_dim + tril_dim]
    return mu, cov


def mlp3_ref(x, params):
    """Pure-JAX reference of one unfused head."""
    w1, b1, w2, b2, w3, b3 = params
    h1 = jnp.maximum(x @ w1 + b1, 0.0)
    h2 = jnp.maximum(h1 @ w2 + b2, 0.0)
    return h2 @ w3 + b3


if __name__ == "__main__":
    input_dim = 16
    hidden_dim = 32
    output_dim = 6
    tril_dim = output_dim * (output_dim + 1) // 2  # 21
    batch = 8

    key = jax.random.PRNGKey(0)
    kx, kmu, kcov = jax.random.split(key, 3)

    x = jax.random.normal(kx, (batch, input_dim), jnp.float32)
    mu_params = init_head(kmu, input_dim, hidden_dim, output_dim)
    cov_params = init_head(kcov, input_dim, hidden_dim, tril_dim)

    # Pack once (amortized across all forward() calls).
    packed = pack_policy_params(mu_params, cov_params, input_dim, hidden_dim,
                                output_dim, tril_dim)
    packed = jax.tree_util.tree_map(jax.block_until_ready, packed)

    mu, cov = mv_gaussian_policy_forward(x, packed, output_dim, tril_dim)
    mu = jax.block_until_ready(mu)
    cov = jax.block_until_ready(cov)

    assert mu.shape == (batch, output_dim)
    assert cov.shape == (batch, tril_dim)

    # Correctness check against pure-JAX references of the unfused heads.
    mu_ref = mlp3_ref(x, mu_params)
    cov_ref = mlp3_ref(x, cov_params)
    assert jnp.allclose(mu, mu_ref, atol=1e-5, rtol=1e-5)
    assert jnp.allclose(cov, cov_ref, atol=1e-5, rtol=1e-5)

    # TODO(synk): select_action / get_log_prob / reshape_output (tril scatter,
    # exp on diagonal, MultivariateNormal sample/log_prob/entropy) are
    # distribution utilities outside forward(); not implemented in-kernel.

    print("KERNEL_OK")
</pallas_src>

<mosaic_0001>
module attributes {stable_mosaic.version = 11 : i64} {
  func.func @fused_policy_kernel(%arg0: memref<8x16xf32, #tpu.memory_space<vmem>>, %arg1: memref<16x128xf32, #tpu.memory_space<vmem>>, %arg2: memref<128x128xf32, #tpu.memory_space<vmem>>, %arg3: memref<128x128xf32, #tpu.memory_space<vmem>>, %arg4: memref<3x128xf32, #tpu.memory_space<vmem>>, %arg5: memref<8x128xf32, #tpu.memory_space<vmem>>) attributes {dimension_semantics = [], scalar_prefetch = 0 : i64, scratch_operands = 0 : i64, tpu.core_type = #tpu.core_type<tc>} {
    %c0 = arith.constant 0 : index
    %c0_0 = arith.constant 0 : index
    %0 = vector.load %arg0[%c0, %c0_0] : memref<8x16xf32, #tpu.memory_space<vmem>>, vector<8x16xf32>
    %c0_1 = arith.constant 0 : index
    %c0_2 = arith.constant 0 : index
    %1 = vector.load %arg4[%c0_1, %c0_2] : memref<3x128xf32, #tpu.memory_space<vmem>>, vector<1x128xf32>
    %c1 = arith.constant 1 : index
    %c0_3 = arith.constant 0 : index
    %2 = vector.load %arg4[%c1, %c0_3] : memref<3x128xf32, #tpu.memory_space<vmem>>, vector<1x128xf32>
    %c2 = arith.constant 2 : index
    %c0_4 = arith.constant 0 : index
    %3 = vector.load %arg4[%c2, %c0_4] : memref<3x128xf32, #tpu.memory_space<vmem>>, vector<1x128xf32>
    %c0_5 = arith.constant 0 : index
    %c0_6 = arith.constant 0 : index
    %4 = vector.load %arg1[%c0_5, %c0_6] : memref<16x128xf32, #tpu.memory_space<vmem>>, vector<16x128xf32>
    %cst = arith.constant dense<0.000000e+00> : vector<8x128xf32>
    %5 = tpu.matmul %0, %4, %cst {dimension_numbers = #tpu.dot_dimension_numbers<[1], [0], [0], [1], [0, 0, 1, 1], [], []>} : vector<8x16xf32>, vector<16x128xf32>, vector<8x128xf32> -> vector<8x128xf32>
    %6 = vector.broadcast %1 : vector<1x128xf32> to vector<8x128xf32>
    %7 = arith.addf %5, %6 : vector<8x128xf32>
    %cst_7 = arith.constant 0.000000e+00 : f32
    %8 = vector.broadcast %cst_7 : f32 to vector<8x128xf32>
    %9 = arith.maximumf %7, %8 : vector<8x128xf32>
    %c0_8 = arith.constant 0 : index
    %c0_9 = arith.constant 0 : index
    %10 = vector.load %arg2[%c0_8, %c0_9] : memref<128x128xf32, #tpu.memory_space<vmem>>, vector<128x128xf32>
    %cst_10 = arith.constant dense<0.000000e+00> : vector<8x128xf32>
    %11 = tpu.matmul %9, %10, %cst_10 {dimension_numbers = #tpu.dot_dimension_numbers<[1], [0], [0], [1], [0, 0, 1, 1], [], []>} : vector<8x128xf32>, vector<128x128xf32>, vector<8x128xf32> -> vector<8x128xf32>
    %12 = vector.broadcast %2 : vector<1x128xf32> to vector<8x128xf32>
    %13 = arith.addf %11, %12 : vector<8x128xf32>
    %cst_11 = arith.constant 0.000000e+00 : f32
    %14 = vector.broadcast %cst_11 : f32 to vector<8x128xf32>
    %15 = arith.maximumf %13, %14 : vector<8x128xf32>
    %c0_12 = arith.constant 0 : index
    %c0_13 = arith.constant 0 : index
    %16 = vector.load %arg3[%c0_12, %c0_13] : memref<128x128xf32, #tpu.memory_space<vmem>>, vector<128x128xf32>
    %cst_14 = arith.constant dense<0.000000e+00> : vector<8x128xf32>
    %17 = tpu.matmul %15, %16, %cst_14 {dimension_numbers = #tpu.dot_dimension_numbers<[1], [0], [0], [1], [0, 0, 1, 1], [], []>} : vector<8x128xf32>, vector<128x128xf32>, vector<8x128xf32> -> vector<8x128xf32>
    %18 = vector.broadcast %3 : vector<1x128xf32> to vector<8x128xf32>
    %19 = arith.addf %17, %18 : vector<8x128xf32>
    %c0_15 = arith.constant 0 : index
    %c0_16 = arith.constant 0 : index
    %20 = vector.load %arg5[%c0_15, %c0_16] : memref<8x128xf32, #tpu.memory_space<vmem>>, vector<8x128xf32>
    tpu.vector_store %arg5[%c0_15, %c0_16], %19 {strides = array<i32>} : memref<8x128xf32, #tpu.memory_space<vmem>>, vector<8x128xf32>,
    return
  }
}

</mosaic_0001>

<bundles_post_ra>
// kernel: tpu_custom_call.1
= control target key start
LH: loop header
LB: loop body
LE: loop exit
PB: predicated region body
PF: predicated region fallthrough
CT: control target
= control target key end

     0   :  { %10 = vsyncpa [#allocation3], 0  ;;  %s442_s0 = inlined_call_operand.hbm [shape: f32[8,16], index: 0, kind: input, shape index: {}]   ;;  %s443_s1 = inlined_call_operand.hbm [shape: f32[16,128], index: 1, kind: input, shape index: {}]   ;;  %s444_s2 = inlined_call_operand.hbm [shape: f32[128,128], index: 2, kind: input, shape index: {}]   ;;  %s445_s3 = inlined_call_operand.hbm [shape: f32[128,128], index: 3, kind: input, shape index: {}]   ;;  %s446_s4 = inlined_call_operand.hbm [shape: f32[3,128], index: 4, kind: input, shape index: {}]   ;;  %s447_s5 = inlined_call_operand.hbm [shape: f32[8,128], index: 5, kind: output, shape index: {}]  }
   0x1   :  { %11 = vsyncpa [#allocation6], 0 }
   0x2   :  { %12 = vsyncpa [#allocation9], 0  ;;  %s29_s20 = sshll.u32 %s443_s1, 4  ;;  %s30_s20 = int_to_ptr.hbm [resolvable:$true] %s29_s20 }
   0x3   :  { %13 = vsyncpa [#allocation4], 0  ;;  %s386_s21 = smov [#allocation5]   ;;  %s55_s25 = sshll.u32 %s445_s3, 4  ;;  %s56_s25 = int_to_ptr.hbm [resolvable:$true] %s55_s25 }
   0x4   :  { %s31_s22 = sshll.u32 %s386_s21, 4  ;;  %s387_s26 = smov 128   ;;  %s32_s22 = int_to_ptr.vmem [resolvable:$true] %s31_s22 }
   0x5   :  { %s388_s27 = smov 8   ;;  %s389_s28 = smov [#allocation8]  }
   0x6   :  { %37 = dma.hbm_to_vmem [thread:$0]  %s30_s20, 256, %s32_s22, [#allocation6], %s387_s26, %s387_s26, %s388_s27  }
   0x7   :  { %s57_s29 = sshll.u32 %s389_s28, 4  ;;  %s19_s7 = sshll.u32 %s442_s0, 4  ;;  %s58_s29 = int_to_ptr.vmem [resolvable:$true] %s57_s29  ;;  %s20_s7 = int_to_ptr.hbm [resolvable:$true] %s19_s7 }
   0x8   :  { %63 = dma.hbm_to_vmem [thread:$0]  %s56_s25, 2048, %s58_s29, [#allocation9], %s387_s26, %s387_s26, %s388_s27  }
   0x9   :  { %s42_s9 = sshll.u32 %s444_s2, 4  ;;  %s390_s10 = smov [#allocation2]   ;;  %s43_s9 = int_to_ptr.hbm [resolvable:$true] %s42_s9 }
   0xa   :  { %s21_s11 = sshll.u32 %s390_s10, 4  ;;  %s391_s3 = smov [#allocation7]   ;;  %s22_s11 = int_to_ptr.vmem [resolvable:$true] %s21_s11 }
   0xb   :  { %24 = dma.hbm_to_vmem [thread:$0]  %s20_s7, 128, %s22_s11, [#allocation3]  }
   0xc   :  { %s44_s12 = sshll.u32 %s391_s3, 4  ;;  %s69_s15 = sshll.u32 %s446_s4, 4  ;;  %s45_s12 = int_to_ptr.vmem [resolvable:$true] %s44_s12  ;;  %s70_s15 = int_to_ptr.hbm [resolvable:$true] %s69_s15 }
   0xd   :  { %50 = dma.hbm_to_vmem [thread:$0]  %s43_s9, 2048, %s45_s12, [#allocation6], %s387_s26, %s387_s26, %s388_s27  }
   0xe   :  { %s392_s0 = smov [#allocation10]  }
   0xf   :  { %s71_s16 = sshll.u32 %s392_s0, 4  ;;  %s72_s16 = int_to_ptr.vmem [resolvable:$true] %s71_s16 }
  0x10   :  { %74 = dma.hbm_to_vmem [thread:$0]  %s70_s15, 64, %s72_s16, [#allocation9]  }
  0x11   :  { %378 = dma.done.wait [#allocation3], 128  }
  0x12   :  { %379 = vsyncadd [#allocation3], 4294967168 }
  0x13   :  { %380 = dma.done.wait [#allocation6], 2304  }
  0x14   :  { %381 = vsyncadd [#allocation6], 4294964992 }
  0x15   :  { %382 = dma.done.wait [#allocation9], 2112  }
  0x16   :  { %383 = vsyncadd [#allocation9], 4294965184  ;;  %v100_v0 = vld [vmem:[#allocation5 + $0x8] sm:$0xff]  ;;  %v99_v1 = vld [vmem:[#allocation5] sm:$0xff]  ;;  %vm102_vm0 = vcmask 130048   ;;  %s393_s2 = smov [#allocation11]  }
  0x17   :  { %120 = vmatpush.msra.mxu0 %v100_v0  ;;  %v95_v2 = vld [vmem:[#allocation2] sm:$0xff]  ;;  %v142_v3 = vld [vmem:[#allocation7 + $0x78] sm:$0xff]  ;;  %v141_v4 = vld [vmem:[#allocation7 + $0x70] sm:$0xff]  ;;  %s208_s4 = sshll.u32 %s393_s2, 4  ;;  %s210_s19 = sshll.u32 %s447_s5, 4  ;;  %s209_s4 = int_to_ptr.vmem [resolvable:$true] %s208_s4  ;;  %s211_s19 = int_to_ptr.hbm [resolvable:$true] %s210_s19 }
  0x18   :  { %144 = vmatpush.msra.mxu1 %v142_v3  ;;  %v140_v5 = vld [vmem:[#allocation7 + $0x68] sm:$0xff]  ;;  %v139_v6 = vld [vmem:[#allocation7 + $0x60] sm:$0xff]  ;;  %v138_v7 = vld [vmem:[#allocation7 + $0x58] sm:$0xff] }
  0x19   :  { %121 = vmatpush.msra.mxu0 %v99_v1  ;;  %v137_v8 = vld [vmem:[#allocation7 + $0x50] sm:$0xff]  ;;  %v136_v9 = vld [vmem:[#allocation7 + $0x48] sm:$0xff]  ;;  %v135_v10 = vld [vmem:[#allocation7 + $0x40] sm:$0xff] }
  0x1a   :  { %222 = vmatmul.msk.f32.vlgmr.msra.gmra.mxu0 %vm102_vm0, %v95_v2  ;;  %145 = vmatpush.msra.mxu1 %v141_v4  ;;  %v134_v11 = vld [vmem:[#allocation7 + $0x38] sm:$0xff]  ;;  %v133_v12 = vld [vmem:[#allocation7 + $0x30] sm:$0xff]  ;;  %v132_v13 = vld [vmem:[#allocation7 + $0x28] sm:$0xff] }
  0x1b   :  { %v131_v14 = vld [vmem:[#allocation7 + $0x20] sm:$0xff]  ;;  %v130_v15 = vld [vmem:[#allocation7 + $0x18] sm:$0xff]  ;;  %v129_v16 = vld [vmem:[#allocation7 + $0x10] sm:$0xff] }
  0x1c   :  { %146 = vmatpush.msra.mxu1 %v140_v5  ;;  %v128_v17 = vld [vmem:[#allocation7 + $0x8] sm:$0xff]  ;;  %v127_v18 = vld [vmem:[#allocation7] sm:$0xff]  ;;  %v180_v19 = vld [vmem:[#allocation8 + $0x78] sm:$0xff] }
  0x1d   :  { %v179_v20 = vld [vmem:[#allocation8 + $0x70] sm:$0xff]  ;;  %182 = vmatpush.msra.mxu2 %v180_v19  ;;  %v178_v21 = vld [vmem:[#allocation8 + $0x68] sm:$0xff]  ;;  %v177_v22 = vld [vmem:[#allocation8 + $0x60] sm:$0xff] }
  0x1e   :  { %147 = vmatpush.msra.mxu1 %v139_v6  ;;  %v176_v23 = vld [vmem:[#allocation8 + $0x58] sm:$0xff]  ;;  %v175_v24 = vld [vmem:[#allocation8 + $0x50] sm:$0xff]  ;;  %v174_v25 = vld [vmem:[#allocation8 + $0x48] sm:$0xff] }
  0x1f   :  { %183 = vmatpush.msra.mxu2 %v179_v20  ;;  %v173_v26 = vld [vmem:[#allocation8 + $0x40] sm:$0xff]  ;;  %v172_v27 = vld [vmem:[#allocation8 + $0x38] sm:$0xff]  ;;  %v171_v28 = vld [vmem:[#allocation8 + $0x30] sm:$0xff] }
  0x20   :  { %148 = vmatpush.msra.mxu1 %v138_v7  ;;  %v170_v29 = vld [vmem:[#allocation8 + $0x28] sm:$0xff]  ;;  %v169_v30 = vld [vmem:[#allocation8 + $0x20] sm:$0xff]  ;;  %v168_v31 = vld [vmem:[#allocation8 + $0x18] sm:$0xff] }
  0x21   :  { %184 = vmatpush.msra.mxu2 %v178_v21  ;;  %v231_v32 = vld [vmem:[#allocation10] ss:$0 sm:$0xff]  ;;  %v167_v36 = vld [vmem:[#allocation8 + $0x10] sm:$0xff]  ;;  %v166_v37 = vld [vmem:[#allocation8 + $0x8] sm:$0xff] }
  0x22   :  { %149 = vmatpush.msra.mxu1 %v137_v8  ;;  %v165_v38 = vld [vmem:[#allocation8] sm:$0xff] }
  0x23   :  { %185 = vmatpush.msra.mxu2 %v177_v22  ;;  %v232_v39 = vld [vmem:[#allocation10 + $0x1] ss:$0 sm:$0xff]  ;;  %v233_v43 = vld [vmem:[#allocation10 + $0x2] ss:$0 sm:$0xff] }
  0x24   :  { %150 = vmatpush.msra.mxu1 %v136_v9 }
  0x25   :  { %186 = vmatpush.msra.mxu2 %v176_v23 }
  0x26   :  { %151 = vmatpush.msra.mxu1 %v135_v10 }
  0x27   :  { %187 = vmatpush.msra.mxu2 %v175_v24 }
  0x28   :  { %152 = vmatpush.msra.mxu1 %v134_v11 }
  0x29   :  { %188 = vmatpush.msra.mxu2 %v174_v25 }
  0x2a   :  { %153 = vmatpush.msra.mxu1 %v133_v12 }
  0x2b   :  { %189 = vmatpush.msra.mxu2 %v173_v26 }
  0x2c   :  { %154 = vmatpush.msra.mxu1 %v132_v13 }
  0x2d   :  { %190 = vmatpush.msra.mxu2 %v172_v27 }
  0x2e   :  { %155 = vmatpush.msra.mxu1 %v131_v14 }
  0x2f   :  { %191 = vmatpush.msra.mxu2 %v171_v28 }
  0x30   :  { %156 = vmatpush.msra.mxu1 %v130_v15 }
  0x31   :  { %192 = vmatpush.msra.mxu2 %v170_v29 }
  0x32   :  { %157 = vmatpush.msra.mxu1 %v129_v16 }
  0x33   :  { %193 = vmatpush.msra.mxu2 %v169_v30 }
  0x34   :  { %158 = vmatpush.msra.mxu1 %v128_v17 }
  0x35   :  { %194 = vmatpush.msra.mxu2 %v168_v31 }
  0x36   :  { %159 = vmatpush.msra.mxu1 %v127_v18 }
  0x37   :  { %195 = vmatpush.msra.mxu2 %v167_v36 }
  0x39   :  { %196 = vmatpush.msra.mxu2 %v166_v37 }
  0x3b   :  { %197 = vmatpush.msra.mxu2 %v165_v38 }
  0x97   :  { %v123_v33 = vpop.f32.mrf.mxu0 }
  0x98   :  { %v124_v34 = vadd.f32 %v231_v32, %v123_v33 }
  0x9a   :  { %v126_v35 = vmax.f32 %v124_v34, 0.0 }
  0x9c   :  { %160 = vmatmul.f32.vlgmr.msra.gmra.mxu1 %v126_v35 }
 0x119   :  { %v161_v40 = vpop.f32.mrf.mxu1 }
 0x11a   :  { %v162_v41 = vadd.f32 %v232_v39, %v161_v40 }
 0x11c   :  { %v164_v42 = vmax.f32 %v162_v41, 0.0 }
 0x11e   :  { %198 = vmatmul.f32.vlgmr.msra.gmra.mxu2 %v164_v42 }
 0x1a1   :  { %v199_v44 = vpop.f32.mrf.mxu2 }
 0x1a2   :  { %v200_v45 = vadd.f32 %v233_v43, %v199_v44 }
 0x1a4   :  { %202 = vst [vmem:[#allocation11] sm:$0xff] %v200_v45 }
 0x1a5   :  { %213 = dma.vmem_to_hbm [thread:$0]  %s209_s4, 128, %s211_s19, [#allocation4]  }
 0x1a6   :  { %384 = dma.done.wait [#allocation4], 128  }
 0x1a7   :  { %385 = vsyncadd [#allocation4], 4294967168 }
 0x1a8   :  { %218 = vsyncpa [#allocation3], 1 }
 0x1a9   :  { %219 = vsyncpa [#allocation6], 1 }
 0x1aa   :  { %220 = vsyncpa [#allocation9], 1 }
 0x1ab   :  { %221 = vsyncpa [#allocation4], 1 }

</bundles_post_ra>
